<compile_context>
chip_gen: v7x
topology: tpu7x:2x2x1
jax: 0.10.0
libtpu: 0.0.40
codegen_flags: <defaults>
</compile_context>

<pallas_src>
import jax
import jax.numpy as jnp
from jax.experimental import pallas as pl
from jax.experimental.pallas import tpu as pltpu


def _round_up(x, m):
    return (x + m - 1) // m * m


# --------------------------------------------------------------------------
# Kernel body: one row tile, o = relu(x @ w1 + b1) @ w2 + b2
# --------------------------------------------------------------------------
def dec2_kernel(x_ref, w1_ref, b1_ref, w2_ref, b2_ref, o_ref):
    h = jnp.dot(x_ref[...], w1_ref[...], preferred_element_type=jnp.float32)
    h = jnp.maximum(h + b1_ref[...], 0.0)                      # bias + ReLU (f32)
    o = jnp.dot(h.astype(w2_ref.dtype), w2_ref[...],
                preferred_element_type=jnp.float32)
    o_ref[...] = (o + b2_ref[...]).astype(o_ref.dtype)


# --------------------------------------------------------------------------
# Parameter preparation (do this ONCE, reuse across forward calls)
# --------------------------------------------------------------------------
def prepare_dec2_params(w1, b1, w2, b2, *, use_bf16=False):
    """Convert PyTorch nn.Linear parameters to kernel layout.

    w1: (nhid, nembed), b1: (nhid,)   -- mlp1
    w2: (nfeat, nhid),  b2: (nfeat,)  -- mlp2
    Returns (w1t, b1r, w2t, b2r) with weights in (in, out) layout.
    use_bf16=True casts MXU operands to bfloat16 (f32 accumulation kept);
    this roughly halves weight/activation HBM+VMEM traffic but loosens the
    achievable numerical tolerance.
    """
    wdt = jnp.bfloat16 if use_bf16 else jnp.float32
    w1t = jnp.asarray(w1, jnp.float32).T.astype(wdt)           # (nembed, nhid)
    w2t = jnp.asarray(w2, jnp.float32).T.astype(wdt)           # (nhid, nfeat)
    b1r = jnp.asarray(b1, jnp.float32).reshape(1, -1)          # (1, nhid) f32
    b2r = jnp.asarray(b2, jnp.float32).reshape(1, -1)          # (1, nfeat) f32
    return w1t, b1r, w2t, b2r


# --------------------------------------------------------------------------
# Tile sizing / VMEM budgeting
# --------------------------------------------------------------------------
def _choose_tile(M, nembed, nhid, nfeat, in_itemsize, w_itemsize, tile_m):
    # VMEM layout rounds the last two dims up to (8, 128) tiles.
    ne_v = _round_up(nembed, 128)
    nh_v = _round_up(nhid, 128)
    nf_v = _round_up(nfeat, 128)
    # Resident params; assume worst-case double buffering in the estimate.
    param_bytes = (2 * (ne_v * nh_v + nh_v * nf_v) * w_itemsize
                   + 2 * 8 * (nh_v + nf_v) * 4)

    # Aim for >= 8 grid steps so ("parallel",) can shard rows across the two
    # TensorCores on v7x, while still defaulting to a large DMA-friendly tile.
    tm = max(8, min(tile_m, _round_up(pl.cdiv(M, 8), 8)))

    def working_set(t):
        return (2 * t * ne_v * in_itemsize       # double-buffered x tiles
                + 2 * t * nf_v * 4               # double-buffered out tiles
                + t * nh_v * 4                   # fused hidden activation
                + param_bytes)

    budget = 40 * 2**20  # conservative across v5e/v6e (128 MiB) and v7x (64 MiB)
    while tm > 8 and working_set(tm) > budget:
        tm = max(8, _round_up(tm // 2, 8))

    vmem_limit = int(min(max(int(working_set(tm) * 1.4), 32 * 2**20), 96 * 2**20))
    return tm, vmem_limit


def _build_dec2_call(M, tm, nembed, nhid, nfeat, vmem_limit, single_buffer_params):
    def param_spec(shape):
        # Constant block index -> the weight stays VMEM-resident; a single
        # buffer is enough (saves half the param footprint on v7x's 64 MiB).
        if single_buffer_params:
            return pl.BlockSpec(shape, lambda i: (0, 0),
                                pipeline_mode=pl.Buffered(1))
        return pl.BlockSpec(shape, lambda i: (0, 0))

    return pl.pallas_call(
        dec2_kernel,
        out_shape=jax.ShapeDtypeStruct((M, nfeat), jnp.float32),
        grid=(pl.cdiv(M, tm),),                      # ragged last block is OK:
        in_specs=[                                   # OOB rows are discarded.
            pl.BlockSpec((tm, nembed), lambda i: (i, 0)),   # x row tile
            param_spec((nembed, nhid)),                     # W1 (resident)
            param_spec((1, nhid)),                          # b1 (resident)
            param_spec((nhid, nfeat)),                      # W2 (resident)
            param_spec((1, nfeat)),                         # b2 (resident)
        ],
        out_specs=pl.BlockSpec((tm, nfeat), lambda i: (i, 0)),
        compiler_params=pltpu.CompilerParams(
            dimension_semantics=("parallel",),
            vmem_limit_bytes=vmem_limit,
        ),
    )


# --------------------------------------------------------------------------
# Forward
# --------------------------------------------------------------------------
def dec2_forward(x, params, *, tile_m=1024):
    """Dec2 forward.  x: (..., nembed); params from prepare_dec2_params()."""
    w1t, b1r, w2t, b2r = params
    nembed, nhid = w1t.shape
    nfeat = w2t.shape[1]
    lead = x.shape[:-1]

    x2 = x.reshape(-1, nembed).astype(w1t.dtype)     # no padding, no extra copy
    M = x2.shape[0]

    tm, vmem_limit = _choose_tile(
        M, nembed, nhid, nfeat,
        jnp.dtype(x2.dtype).itemsize, jnp.dtype(w1t.dtype).itemsize, tile_m)

    try:
        out = _build_dec2_call(M, tm, nembed, nhid, nfeat, vmem_limit, True)(
            x2, w1t, b1r, w2t, b2r)
    except Exception:
        # pipeline_mode=pl.Buffered(1) unsupported on this Pallas version/backend:
        # fall back to default (double-buffered) resident-param specs.
        out = _build_dec2_call(M, tm, nembed, nhid, nfeat, vmem_limit, False)(
            x2, w1t, b1r, w2t, b2r)

    # TODO(synk): for very large nembed/nhid (> a few K), add a K-reduction
    # grid axis ("arbitrary") with a VMEM accumulator; unnecessary at Dec2
    # decoder sizes where both weights fit comfortably in VMEM.
    return out.reshape(*lead, nfeat)


# --------------------------------------------------------------------------
# Demo / correctness check
# --------------------------------------------------------------------------
if __name__ == "__main__":
    nembed, nhid, nfeat = 32, 64, 16
    N = 64

    key = jax.random.PRNGKey(0)
    kx, kw1, kb1, kw2, kb2 = jax.random.split(key, 5)
    x = jax.random.normal(kx, (N, nembed), jnp.float32)
    # PyTorch nn.Linear layout: weight (out_features, in_features), bias (out,)
    w1 = 0.1 * jax.random.normal(kw1, (nhid, nembed), jnp.float32)
    b1 = 0.1 * jax.random.normal(kb1, (nhid,), jnp.float32)
    w2 = 0.1 * jax.random.normal(kw2, (nfeat, nhid), jnp.float32)
    b2 = 0.1 * jax.random.normal(kb2, (nfeat,), jnp.float32)

    # Prepare (transpose/reshape) the parameters once; reuse across calls.
    params = prepare_dec2_params(w1, b1, w2, b2)

    out = jax.block_until_ready(dec2_forward(x, params))

    # Pure-JAX reference of Dec2.forward: relu(x @ W1^T + b1) @ W2^T + b2
    h_ref = jnp.maximum(
        jnp.dot(x, w1.T, precision=jax.lax.Precision.HIGHEST) + b1, 0.0)
    ref = jnp.dot(h_ref, w2.T, precision=jax.lax.Precision.HIGHEST) + b2

    assert out.shape == ref.shape
    err = float(jnp.max(jnp.abs(out - ref)))
    assert jnp.allclose(out, ref, rtol=1e-5, atol=1e-4), f"max abs err = {err}"

    # Also exercise a leading batch dim (module applies Linear over (..., nembed)).
    x3 = x.reshape(2, 32, nembed)
    out3 = jax.block_until_ready(dec2_forward(x3, params))
    assert out3.shape == (2, 32, nfeat)
    assert jnp.allclose(out3.reshape(N, nfeat), ref, rtol=1e-5, atol=1e-4)

    print("KERNEL_OK")
</pallas_src>

<mosaic_0001>
module attributes {stable_mosaic.version = 11 : i64} {
  func.func @dec2_kernel(%arg0: i32, %arg1: memref<8x32xf32, #tpu.memory_space<vmem>>, %arg2: memref<32x64xf32, #tpu.memory_space<vmem>>, %arg3: memref<1x64xf32, #tpu.memory_space<vmem>>, %arg4: memref<64x16xf32, #tpu.memory_space<vmem>>, %arg5: memref<1x16xf32, #tpu.memory_space<vmem>>, %arg6: memref<8x16xf32, #tpu.memory_space<vmem>>) attributes {dimension_semantics = [#tpu.dimension_semantics<parallel>], iteration_bounds = array<i64: 8>, scalar_prefetch = 0 : i64, scratch_operands = 0 : i64, tpu.core_type = #tpu.core_type<tc>, window_params = [{transform_indices = @transform_0, window_bounds = array<i64: 8, 32>}, {pipeline_mode = #tpu.pipeline_mode<synchronous>, transform_indices = @transform_1, window_bounds = array<i64: 32, 64>}, {pipeline_mode = #tpu.pipeline_mode<synchronous>, transform_indices = @transform_2, window_bounds = array<i64: 1, 64>}, {pipeline_mode = #tpu.pipeline_mode<synchronous>, transform_indices = @transform_3, window_bounds = array<i64: 64, 16>}, {pipeline_mode = #tpu.pipeline_mode<synchronous>, transform_indices = @transform_4, window_bounds = array<i64: 1, 16>}, {transform_indices = @transform_5, window_bounds = array<i64: 8, 16>}]} {
    %c0 = arith.constant 0 : index
    %c0_0 = arith.constant 0 : index
    %0 = vector.load %arg1[%c0, %c0_0] : memref<8x32xf32, #tpu.memory_space<vmem>>, vector<8x32xf32>
    %c0_1 = arith.constant 0 : index
    %c0_2 = arith.constant 0 : index
    %1 = vector.load %arg2[%c0_1, %c0_2] : memref<32x64xf32, #tpu.memory_space<vmem>>, vector<32x64xf32>
    %cst = arith.constant dense<0.000000e+00> : vector<8x64xf32>
    %2 = tpu.matmul %0, %1, %cst {dimension_numbers = #tpu.dot_dimension_numbers<[1], [0], [0], [1], [0, 0, 1, 1], [], []>} : vector<8x32xf32>, vector<32x64xf32>, vector<8x64xf32> -> vector<8x64xf32>
    %c0_3 = arith.constant 0 : index
    %c0_4 = arith.constant 0 : index
    %3 = vector.load %arg3[%c0_3, %c0_4] : memref<1x64xf32, #tpu.memory_space<vmem>>, vector<1x64xf32>
    %4 = vector.broadcast %3 : vector<1x64xf32> to vector<8x64xf32>
    %5 = arith.addf %2, %4 : vector<8x64xf32>
    %cst_5 = arith.constant 0.000000e+00 : f32
    %6 = vector.broadcast %cst_5 : f32 to vector<8x64xf32>
    %7 = arith.maximumf %5, %6 : vector<8x64xf32>
    %c0_6 = arith.constant 0 : index
    %c0_7 = arith.constant 0 : index
    %8 = vector.load %arg4[%c0_6, %c0_7] : memref<64x16xf32, #tpu.memory_space<vmem>>, vector<64x16xf32>
    %cst_8 = arith.constant dense<0.000000e+00> : vector<8x16xf32>
    %9 = tpu.matmul %7, %8, %cst_8 {dimension_numbers = #tpu.dot_dimension_numbers<[1], [0], [0], [1], [0, 0, 1, 1], [], []>} : vector<8x64xf32>, vector<64x16xf32>, vector<8x16xf32> -> vector<8x16xf32>
    %c0_9 = arith.constant 0 : index
    %c0_10 = arith.constant 0 : index
    %10 = vector.load %arg5[%c0_9, %c0_10] : memref<1x16xf32, #tpu.memory_space<vmem>>, vector<1x16xf32>
    %11 = vector.broadcast %10 : vector<1x16xf32> to vector<8x16xf32>
    %12 = arith.addf %9, %11 : vector<8x16xf32>
    %c0_11 = arith.constant 0 : index
    %c0_12 = arith.constant 0 : index
    %13 = vector.load %arg6[%c0_11, %c0_12] : memref<8x16xf32, #tpu.memory_space<vmem>>, vector<8x16xf32>
    tpu.vector_store %arg6[%c0_11, %c0_12], %12 {strides = array<i32>} : memref<8x16xf32, #tpu.memory_space<vmem>>, vector<8x16xf32>,
    return
  }
  func.func @transform_0(%arg0: i32) -> (i32, i32) {
    %c0_i32 = arith.constant 0 : i32
    %c0_i32_0 = arith.constant 0 : i32
    return %arg0, %c0_i32 : i32, i32
  }
  func.func @transform_1(%arg0: i32) -> (i32, i32) {
    %c0_i32 = arith.constant 0 : i32
    %c0_i32_0 = arith.constant 0 : i32
    %c0_i32_1 = arith.constant 0 : i32
    return %c0_i32, %c0_i32_0 : i32, i32
  }
  func.func @transform_2(%arg0: i32) -> (i32, i32) {
    %c0_i32 = arith.constant 0 : i32
    %c0_i32_0 = arith.constant 0 : i32
    %c0_i32_1 = arith.constant 0 : i32
    return %c0_i32, %c0_i32_0 : i32, i32
  }
  func.func @transform_3(%arg0: i32) -> (i32, i32) {
    %c0_i32 = arith.constant 0 : i32
    %c0_i32_0 = arith.constant 0 : i32
    %c0_i32_1 = arith.constant 0 : i32
    return %c0_i32, %c0_i32_0 : i32, i32
  }
  func.func @transform_4(%arg0: i32) -> (i32, i32) {
    %c0_i32 = arith.constant 0 : i32
    %c0_i32_0 = arith.constant 0 : i32
    %c0_i32_1 = arith.constant 0 : i32
    return %c0_i32, %c0_i32_0 : i32, i32
  }
  func.func @transform_5(%arg0: i32) -> (i32, i32) {
    %c0_i32 = arith.constant 0 : i32
    %c0_i32_0 = arith.constant 0 : i32
    return %arg0, %c0_i32 : i32, i32
  }
}

module attributes {stable_mosaic.version = 11 : i64} {
  func.func @dec2_kernel(%arg0: i32, %arg1: memref<8x32xf32, #tpu.memory_space<vmem>>, %arg2: memref<32x64xf32, #tpu.memory_space<vmem>>, %arg3: memref<1x64xf32, #tpu.memory_space<vmem>>, %arg4: memref<64x16xf32, #tpu.memory_space<vmem>>, %arg5: memref<1x16xf32, #tpu.memory_space<vmem>>, %arg6: memref<8x16xf32, #tpu.memory_space<vmem>>) attributes {dimension_semantics = [#tpu.dimension_semantics<parallel>], iteration_bounds = array<i64: 8>, scalar_prefetch = 0 : i64, scratch_operands = 0 : i64, tpu.core_type = #tpu.core_type<tc>, window_params = [{transform_indices = @transform_0, window_bounds = array<i64: 8, 32>}, {pipeline_mode = #tpu.pipeline_mode<synchronous>, transform_indices = @transform_1, window_bounds = array<i64: 32, 64>}, {pipeline_mode = #tpu.pipeline_mode<synchronous>, transform_indices = @transform_2, window_bounds = array<i64: 1, 64>}, {pipeline_mode = #tpu.pipeline_mode<synchronous>, transform_indices = @transform_3, window_bounds = array<i64: 64, 16>}, {pipeline_mode = #tpu.pipeline_mode<synchronous>, transform_indices = @transform_4, window_bounds = array<i64: 1, 16>}, {transform_indices = @transform_5, window_bounds = array<i64: 8, 16>}]} {
    %c0 = arith.constant 0 : index
    %c0_0 = arith.constant 0 : index
    %0 = vector.load %arg1[%c0, %c0_0] : memref<8x32xf32, #tpu.memory_space<vmem>>, vector<8x32xf32>
    %c0_1 = arith.constant 0 : index
    %c0_2 = arith.constant 0 : index
    %1 = vector.load %arg2[%c0_1, %c0_2] : memref<32x64xf32, #tpu.memory_space<vmem>>, vector<32x64xf32>
    %cst = arith.constant dense<0.000000e+00> : vector<8x64xf32>
    %2 = tpu.matmul %0, %1, %cst {dimension_numbers = #tpu.dot_dimension_numbers<[1], [0], [0], [1], [0, 0, 1, 1], [], []>} : vector<8x32xf32>, vector<32x64xf32>, vector<8x64xf32> -> vector<8x64xf32>
    %c0_3 = arith.constant 0 : index
    %c0_4 = arith.constant 0 : index
    %3 = vector.load %arg3[%c0_3, %c0_4] : memref<1x64xf32, #tpu.memory_space<vmem>>, vector<1x64xf32>
    %4 = vector.broadcast %3 : vector<1x64xf32> to vector<8x64xf32>
    %5 = arith.addf %2, %4 : vector<8x64xf32>
    %cst_5 = arith.constant 0.000000e+00 : f32
    %6 = vector.broadcast %cst_5 : f32 to vector<8x64xf32>
    %7 = arith.maximumf %5, %6 : vector<8x64xf32>
    %c0_6 = arith.constant 0 : index
    %c0_7 = arith.constant 0 : index
    %8 = vector.load %arg4[%c0_6, %c0_7] : memref<64x16xf32, #tpu.memory_space<vmem>>, vector<64x16xf32>
    %cst_8 = arith.constant dense<0.000000e+00> : vector<8x16xf32>
    %9 = tpu.matmul %7, %8, %cst_8 {dimension_numbers = #tpu.dot_dimension_numbers<[1], [0], [0], [1], [0, 0, 1, 1], [], []>} : vector<8x64xf32>, vector<64x16xf32>, vector<8x16xf32> -> vector<8x16xf32>
    %c0_9 = arith.constant 0 : index
    %c0_10 = arith.constant 0 : index
    %10 = vector.load %arg5[%c0_9, %c0_10] : memref<1x16xf32, #tpu.memory_space<vmem>>, vector<1x16xf32>
    %11 = vector.broadcast %10 : vector<1x16xf32> to vector<8x16xf32>
    %12 = arith.addf %9, %11 : vector<8x16xf32>
    %c0_11 = arith.constant 0 : index
    %c0_12 = arith.constant 0 : index
    %13 = vector.load %arg6[%c0_11, %c0_12] : memref<8x16xf32, #tpu.memory_space<vmem>>, vector<8x16xf32>
    tpu.vector_store %arg6[%c0_11, %c0_12], %12 {strides = array<i32>} : memref<8x16xf32, #tpu.memory_space<vmem>>, vector<8x16xf32>,
    return
  }
  func.func @transform_0(%arg0: i32) -> (i32, i32) {
    %c0_i32 = arith.constant 0 : i32
    %c0_i32_0 = arith.constant 0 : i32
    return %arg0, %c0_i32 : i32, i32
  }
  func.func @transform_1(%arg0: i32) -> (i32, i32) {
    %c0_i32 = arith.constant 0 : i32
    %c0_i32_0 = arith.constant 0 : i32
    %c0_i32_1 = arith.constant 0 : i32
    return %c0_i32, %c0_i32_0 : i32, i32
  }
  func.func @transform_2(%arg0: i32) -> (i32, i32) {
    %c0_i32 = arith.constant 0 : i32
    %c0_i32_0 = arith.constant 0 : i32
    %c0_i32_1 = arith.constant 0 : i32
    return %c0_i32, %c0_i32_0 : i32, i32
  }
  func.func @transform_3(%arg0: i32) -> (i32, i32) {
    %c0_i32 = arith.constant 0 : i32
    %c0_i32_0 = arith.constant 0 : i32
    %c0_i32_1 = arith.constant 0 : i32
    return %c0_i32, %c0_i32_0 : i32, i32
  }
  func.func @transform_4(%arg0: i32) -> (i32, i32) {
    %c0_i32 = arith.constant 0 : i32
    %c0_i32_0 = arith.constant 0 : i32
    %c0_i32_1 = arith.constant 0 : i32
    return %c0_i32, %c0_i32_0 : i32, i32
  }
  func.func @transform_5(%arg0: i32) -> (i32, i32) {
    %c0_i32 = arith.constant 0 : i32
    %c0_i32_0 = arith.constant 0 : i32
    return %arg0, %c0_i32 : i32, i32
  }
}

</mosaic_0001>

<bundles_post_ra>
// kernel: tpu_custom_call.1
= control target key start
LH: loop header
LB: loop body
LE: loop exit
PB: predicated region body
PF: predicated region fallthrough
CT: control target
= control target key end

     0   :  { %s578_s18 = smov 0   ;;  %s640_s0 = inlined_call_operand.vmem [shape: f32[64,32], index: 0, kind: input, shape index: {}]   ;;  %s641_s1 = inlined_call_operand.vmem [shape: f32[32,64], index: 1, kind: input, shape index: {}]   ;;  %s642_s2 = inlined_call_operand.vmem [shape: f32[1,64], index: 2, kind: input, shape index: {}]   ;;  %s643_s3 = inlined_call_operand.vmem [shape: f32[64,16], index: 3, kind: input, shape index: {}]   ;;  %s644_s4 = inlined_call_operand.vmem [shape: f32[1,16], index: 4, kind: input, shape index: {}]   ;;  %s645_s5 = inlined_call_operand.vmem [shape: f32[64,16], index: 5, kind: output, shape index: {}]  }
   0x1 LB: > { %s451_s19 = sadd.s32 4294967295, %s543_s18   ;;  %p455_p0 = scmp.ge.s32.totalorder %s543_s18, 1  ;;  %s543_s18 = sphi %s578_s18, %s15_s18  }
   0x2   : > { %p186_p1 = scmp.lt.s32.totalorder %s543_s18, 9 }
   0x4   : > { %p187_p2 = pnand %p455_p0, %p186_p1 }
   0x5   : > { %v221_v0 = vld [vmem:[%s641_s1] sm:$0xff] (!%p187_p2)  ;;  %v222_v1 = vld [vmem:[%s641_s1 + $0x8] sm:$0xff] (!%p187_p2)  ;;  %v223_v2 = vld [vmem:[%s641_s1 + $0x10] sm:$0xff] (!%p187_p2)  ;;  %v545_v3 = vmov (!%p187_p2), 0.0|0.0   ;;  %vm546_vm0 = vmmov (!%p187_p2), 0   ;;  %v547_v6 = vmov (!%p187_p2), 0.0  }
   0x6   : > { %190 = sbr.rel (%p187_p2) target bundleno = 448 (0x1c0), region = 40  ;;  %508 = vmatprep.subr.bf16.mxu0 (!%p187_p2), %v545_v3  ;;  %v509_v4 = vpack.c.bf16 (!%p187_p2), %v222_v1, %v221_v0  ;;  %v224_v5 = vld [vmem:[%s641_s1 + $0x18] sm:$0xff] (!%p187_p2)  ;;  %486 = vmatprep.mubr.msk.f32.mxu0 (!%p187_p2), %vm546_vm0, %v547_v6  ;;  %p212_p3 = scmp.lt.s32.totalorder (!%p187_p2), %s451_s19, 7  ;;  %v307_v7 = vld [vmem:[%s643_s3] sm:$0xff] (!%p187_p2)  ;;  %v308_v8 = vld [vmem:[%s643_s3 + $0x8] sm:$0xff] (!%p187_p2)  ;;  %vm232_vm1 = vcmask (!%p187_p2), 261120  }
   0x7   : > { %514 = vmatprep.subr.bf16.mxu1 (!%p187_p2), %v545_v3  ;;  %v515_v9 = vpack.c.bf16 (!%p187_p2), %v308_v8, %v307_v7  ;;  %v309_v10 = vld [vmem:[%s643_s3 + $0x10] sm:$0xff] (!%p187_p2)  ;;  %v310_v11 = vld [vmem:[%s643_s3 + $0x18] sm:$0xff] (!%p187_p2)  ;;  %505 = vmatprep.mubr.msk.f32.mxu1 (!%p187_p2), %vm546_vm0, %v547_v6  ;;  %v512_v12 = vpack.c.bf16 (!%p187_p2), %v224_v5, %v223_v2  ;;  %v311_v14 = vld [vmem:[%s643_s3 + $0x20] sm:$0xff] (!%p187_p2)  ;;  %vm322_vm2 = vcmask (!%p187_p2), 523264   ;;  %vm396_vm3 = vcmask (!%p187_p2), 130048  }
   0x8   : > { %510 = vmatpush3.bf16.msra.mxu0 (!%p187_p2), %v509_v4  ;;  %v518_v13 = vpack.c.bf16 (!%p187_p2), %v310_v11, %v309_v10  ;;  %v312_v15 = vld [vmem:[%s643_s3 + $0x28] sm:$0xff] (!%p187_p2)  ;;  %v313_v18 = vld [vmem:[%s643_s3 + $0x30] sm:$0xff] (!%p187_p2)  ;;  %v314_v19 = vld [vmem:[%s643_s3 + $0x38] sm:$0xff] (!%p187_p2) }
   0x9   : > { %511 = vmatprep.subr.bf16.mxu0 (!%p187_p2), %v545_v3  ;;  %516 = vmatpush3.bf16.msra.mxu1 (!%p187_p2), %v515_v9  ;;  %v521_v17 = vpack.c.bf16 (!%p187_p2), %v312_v15, %v311_v14  ;;  %v524_v20 = vpack.c.bf16 (!%p187_p2), %v314_v19, %v313_v18  ;;  %v458_v21 = vld [vmem:[%s642_s2] ss:$0 sm:$0xff] (!%p187_p2) }
   0xa   : > { %517 = vmatprep.subr.bf16.mxu1 (!%p187_p2), %v545_v3  ;;  %v460_v26 = vld [vmem:[%s644_s4] ss:$0 sm:$0xff] (!%p187_p2) }
   0xc   : > { %513 = vmatpush3.bf16.msra.mxu0 (!%p187_p2), %v512_v12 }
   0xd   : > { %s647_s19 = smov (!%p212_p3, %s451_s19), 7  ;;  %519 = vmatpush3.bf16.msra.mxu1 %v518_v13 }
   0xe   : > { %s456_s11 = sshll.u32 %s647_s19, 3  ;;  %520 = vmatprep.subr.bf16.mxu1 %v545_v3 }
   0xf   : > { %s215_s20 = scalar_lea.vmem %s640_s0, %s456_s11  ;;  %s219_s30 = scalar_lea.vmem %s645_s5, %s456_s11 }
  0x10   : > { %v220_v16 = vld [vmem:[%s215_s20] sm:$0xff] }
  0x11   : > { %487 = vmatmul.mubr.msk.f32.vlgmr.msra.gmra.mrb[0].mxu0 %vm232_vm1, %v220_v16  ;;  %522 = vmatpush3.bf16.msra.mxu1 %v521_v17 }
  0x12   : > { %523 = vmatprep.subr.bf16.mxu1 %v545_v3 }
  0x15   : > { %525 = vmatpush3.bf16.msra.mxu1 %v524_v20 }
  0xe4   : > { %v302_v22 = vpop.f32.mrb[0].mxu0 }
  0xe5   : > { %v303_v23 = vadd.f32 %v458_v21, %v302_v22  ;;  %v488_v24 = vpop.f32.mrb[1].mxu0 }
  0xe7   : > { %v306_v25 = vmax.f32 %v303_v23, 0.0 }
  0xe9   : > { %506 = vmatmul.mubr.msk.f32.vlgmr.msra.gmra.mrb[0].mxu1 %vm322_vm2, %v306_v25 }
 0x1bc   : > { %v392_v27 = vpop.f32.mrb[0].mxu1 }
 0x1bd   : > { %v393_v28 = vadd.f32 %v460_v26, %v392_v27  ;;  %v507_v29 = vpop.f32.mrb[1].mxu1 }
 0x1bf   : > { %397 = vst.msk [vmem:[%s219_s30] sm:$0xff] %vm396_vm3, %v393_v28 }
 0x1c0 PF: > { %s15_s18 = sadd.s32 1, %s543_s18  }
 0x1c1   : > { %p12_p4 = scmp.ge.s32.totalorder %s15_s18, 10  }
 0x1c3   :  { %14 = sbr.rel (!%p12_p4) target bundleno = 1 (0x1), region = 70 }

// kernel: tpu_custom_call.1
= control target key start
LH: loop header
LB: loop body
LE: loop exit
PB: predicated region body
PF: predicated region fallthrough
CT: control target
= control target key end

     0   :  { %s578_s18 = smov 0   ;;  %s640_s0 = inlined_call_operand.vmem [shape: f32[64,32], index: 0, kind: input, shape index: {}]   ;;  %s641_s1 = inlined_call_operand.vmem [shape: f32[32,64], index: 1, kind: input, shape index: {}]   ;;  %s642_s2 = inlined_call_operand.vmem [shape: f32[1,64], index: 2, kind: input, shape index: {}]   ;;  %s643_s3 = inlined_call_operand.vmem [shape: f32[64,16], index: 3, kind: input, shape index: {}]   ;;  %s644_s4 = inlined_call_operand.vmem [shape: f32[1,16], index: 4, kind: input, shape index: {}]   ;;  %s645_s5 = inlined_call_operand.vmem [shape: f32[64,16], index: 5, kind: output, shape index: {}]  }
   0x1 LB: > { %s451_s19 = sadd.s32 4294967295, %s543_s18   ;;  %p455_p0 = scmp.ge.s32.totalorder %s543_s18, 1  ;;  %s543_s18 = sphi %s578_s18, %s15_s18  }
   0x2   : > { %p186_p1 = scmp.lt.s32.totalorder %s543_s18, 9 }
   0x4   : > { %p187_p2 = pnand %p455_p0, %p186_p1 }
   0x5   : > { %v221_v0 = vld [vmem:[%s641_s1] sm:$0xff] (!%p187_p2)  ;;  %v222_v1 = vld [vmem:[%s641_s1 + $0x8] sm:$0xff] (!%p187_p2)  ;;  %v223_v2 = vld [vmem:[%s641_s1 + $0x10] sm:$0xff] (!%p187_p2)  ;;  %v545_v3 = vmov (!%p187_p2), 0.0|0.0   ;;  %vm546_vm0 = vmmov (!%p187_p2), 0   ;;  %v547_v6 = vmov (!%p187_p2), 0.0  }
   0x6   : > { %190 = sbr.rel (%p187_p2) target bundleno = 448 (0x1c0), region = 40  ;;  %508 = vmatprep.subr.bf16.mxu0 (!%p187_p2), %v545_v3  ;;  %v509_v4 = vpack.c.bf16 (!%p187_p2), %v222_v1, %v221_v0  ;;  %v224_v5 = vld [vmem:[%s641_s1 + $0x18] sm:$0xff] (!%p187_p2)  ;;  %486 = vmatprep.mubr.msk.f32.mxu0 (!%p187_p2), %vm546_vm0, %v547_v6  ;;  %p212_p3 = scmp.lt.s32.totalorder (!%p187_p2), %s451_s19, 7  ;;  %v307_v7 = vld [vmem:[%s643_s3] sm:$0xff] (!%p187_p2)  ;;  %v308_v8 = vld [vmem:[%s643_s3 + $0x8] sm:$0xff] (!%p187_p2)  ;;  %vm232_vm1 = vcmask (!%p187_p2), 261120  }
   0x7   : > { %514 = vmatprep.subr.bf16.mxu1 (!%p187_p2), %v545_v3  ;;  %v515_v9 = vpack.c.bf16 (!%p187_p2), %v308_v8, %v307_v7  ;;  %v309_v10 = vld [vmem:[%s643_s3 + $0x10] sm:$0xff] (!%p187_p2)  ;;  %v310_v11 = vld [vmem:[%s643_s3 + $0x18] sm:$0xff] (!%p187_p2)  ;;  %505 = vmatprep.mubr.msk.f32.mxu1 (!%p187_p2), %vm546_vm0, %v547_v6  ;;  %v512_v12 = vpack.c.bf16 (!%p187_p2), %v224_v5, %v223_v2  ;;  %v311_v14 = vld [vmem:[%s643_s3 + $0x20] sm:$0xff] (!%p187_p2)  ;;  %vm322_vm2 = vcmask (!%p187_p2), 523264   ;;  %vm396_vm3 = vcmask (!%p187_p2), 130048  }
   0x8   : > { %510 = vmatpush3.bf16.msra.mxu0 (!%p187_p2), %v509_v4  ;;  %v518_v13 = vpack.c.bf16 (!%p187_p2), %v310_v11, %v309_v10  ;;  %v312_v15 = vld [vmem:[%s643_s3 + $0x28] sm:$0xff] (!%p187_p2)  ;;  %v313_v18 = vld [vmem:[%s643_s3 + $0x30] sm:$0xff] (!%p187_p2)  ;;  %v314_v19 = vld [vmem:[%s643_s3 + $0x38] sm:$0xff] (!%p187_p2) }
   0x9   : > { %511 = vmatprep.subr.bf16.mxu0 (!%p187_p2), %v545_v3  ;;  %516 = vmatpush3.bf16.msra.mxu1 (!%p187_p2), %v515_v9  ;;  %v521_v17 = vpack.c.bf16 (!%p187_p2), %v312_v15, %v311_v14  ;;  %v524_v20 = vpack.c.bf16 (!%p187_p2), %v314_v19, %v313_v18  ;;  %v458_v21 = vld [vmem:[%s642_s2] ss:$0 sm:$0xff] (!%p187_p2) }
   0xa   : > { %517 = vmatprep.subr.bf16.mxu1 (!%p187_p2), %v545_v3  ;;  %v460_v26 = vld [vmem:[%s644_s4] ss:$0 sm:$0xff] (!%p187_p2) }
   0xc   : > { %513 = vmatpush3.bf16.msra.mxu0 (!%p187_p2), %v512_v12 }
   0xd   : > { %s647_s19 = smov (!%p212_p3, %s451_s19), 7  ;;  %519 = vmatpush3.bf16.msra.mxu1 %v518_v13 }
   0xe   : > { %s456_s11 = sshll.u32 %s647_s19, 3  ;;  %520 = vmatprep.subr.bf16.mxu1 %v545_v3 }
   0xf   : > { %s215_s20 = scalar_lea.vmem %s640_s0, %s456_s11  ;;  %s219_s30 = scalar_lea.vmem %s645_s5, %s456_s11 }
  0x10   : > { %v220_v16 = vld [vmem:[%s215_s20] sm:$0xff] }
  0x11   : > { %487 = vmatmul.mubr.msk.f32.vlgmr.msra.gmra.mrb[0].mxu0 %vm232_vm1, %v220_v16  ;;  %522 = vmatpush3.bf16.msra.mxu1 %v521_v17 }
  0x12   : > { %523 = vmatprep.subr.bf16.mxu1 %v545_v3 }
  0x15   : > { %525 = vmatpush3.bf16.msra.mxu1 %v524_v20 }
  0xe4   : > { %v302_v22 = vpop.f32.mrb[0].mxu0 }
  0xe5   : > { %v303_v23 = vadd.f32 %v458_v21, %v302_v22  ;;  %v488_v24 = vpop.f32.mrb[1].mxu0 }
  0xe7   : > { %v306_v25 = vmax.f32 %v303_v23, 0.0 }
  0xe9   : > { %506 = vmatmul.mubr.msk.f32.vlgmr.msra.gmra.mrb[0].mxu1 %vm322_vm2, %v306_v25 }
 0x1bc   : > { %v392_v27 = vpop.f32.mrb[0].mxu1 }
 0x1bd   : > { %v393_v28 = vadd.f32 %v460_v26, %v392_v27  ;;  %v507_v29 = vpop.f32.mrb[1].mxu1 }
 0x1bf   : > { %397 = vst.msk [vmem:[%s219_s30] sm:$0xff] %vm396_vm3, %v393_v28 }
 0x1c0 PF: > { %s15_s18 = sadd.s32 1, %s543_s18  }
 0x1c1   : > { %p12_p4 = scmp.ge.s32.totalorder %s15_s18, 10  }
 0x1c3   :  { %14 = sbr.rel (!%p12_p4) target bundleno = 1 (0x1), region = 70 }

</bundles_post_ra>
